<compile_context>
chip_gen: v7x
topology: tpu7x:2x2x1
jax: 0.10.0
libtpu: 0.0.40
codegen_flags: <defaults>
</compile_context>

<pallas_src>
import functools

import jax
import jax.numpy as jnp
from jax.experimental import pallas as pl
from jax.experimental.pallas import tpu as pltpu


def _round_up(x, m):
    return -(-x // m) * m


def _bahdanau_kernel(enc_ref, att2_ref, wenc_ref, wfull_ref, ctx_ref, attw_ref,
                     *, actual_n):
    bt, n, e = enc_ref.shape
    a = att2_ref.shape[-1]

    enc = enc_ref[...]                                          # (bt, N, E), stream dtype

    # w_enc(encoder_out): one MXU matmul over all bt*N rows.  N is padded to a
    # multiple of 16 in the wrapper, so this collapse is layout-free.
    att1 = jnp.dot(enc.reshape(bt * n, e), wenc_ref[...],
                   preferred_element_type=jnp.float32)          # (bt*N, A) f32

    # att2 already holds w_dec(decoder_hidden) + b_dec + b_enc (hoisted in wrapper).
    hidden = jnp.tanh(att1.reshape(bt, n, a)
                      + att2_ref[...][:, None, :])              # (bt, N, A) f32

    # full_att(hidden) -> scores.  Contraction over the lane axis A: VPU multiply +
    # XLU lane reduce (avoids an M=1 batched matvec / per-batch transposes on MXU).
    scores = jnp.sum(hidden * wfull_ref[...], axis=-1)          # (bt, N) f32

    if actual_n < n:  # mask padded locations (static branch)
        col = jax.lax.broadcasted_iota(jnp.int32, (bt, n), 1)
        scores = jnp.where(col < actual_n, scores, -1e30)

    # Numerically stable softmax over N, exact normalization.
    m = jnp.max(scores, axis=-1, keepdims=True)
    ex = jnp.exp(scores - m)
    w = ex / jnp.sum(ex, axis=-1, keepdims=True)                # (bt, N) f32
    attw_ref[...] = w.astype(attw_ref.dtype)

    # attention-weighted encoding: f32 VPU multiply + sublane reduce over N.
    ctx = jnp.sum(enc.astype(jnp.float32) * w[..., None], axis=1)   # (bt, E) f32
    ctx_ref[...] = ctx.astype(ctx_ref.dtype)


def _choose_block_b(B, N_pad, E, A_pad):
    # VMEM-driven row budget per grid step: keep the double-buffered encoder block
    # (+ its f32 working copy) and the f32 att1/hidden intermediates each under
    # ~16 MiB so one step stays well inside a 48 MiB scoped limit (v7x has only
    # 64 MiB physical VMEM).
    rows_cap = min((16 << 20) // (8 * E), (16 << 20) // (8 * A_pad))
    block_b = max(8, (rows_cap // N_pad) // 8 * 8)
    b_ceil = _round_up(B, 8)
    if b_ceil >= 16:
        # Keep >=2 grid steps so dimension_semantics=("parallel",) can shard the
        # batch axis across both TensorCores on v7x (costs nothing on v5e/v6e).
        block_b = min(block_b, _round_up(-(-B // 2), 8))
    else:
        block_b = min(block_b, b_ceil)
    return block_b


def bahdanau_attention(encoder_out, decoder_hidden, params, *,
                       block_b=None, stream_dtype=jnp.bfloat16):
    """encoder_out: (B, N, E), decoder_hidden: (B, A).

    Returns (attention_weighted_encoding (B, E), attention_weights (B, N))."""
    B, N, E = encoder_out.shape
    A = decoder_hidden.shape[-1]

    # Exact zero-padding: A -> lane multiple (128), N -> sublane multiple (16),
    # B -> multiple of the batch block (padded rows/locations are sliced off /
    # masked; zero weight columns make the A pad exact).
    N_pad = _round_up(N, 16)
    A_pad = _round_up(A, 128)
    if block_b is None:
        block_b = _choose_block_b(B, N_pad, E, A_pad)
    B_pad = _round_up(B, block_b)
    grid = (B_pad // block_b,)

    # Hoisted / folded pieces (one batched XLA matmul instead of an in-kernel M=1 dot):
    #   att2 = decoder_hidden @ W_dec^T + b_dec + b_enc   (b_enc folded in here)
    #   full_att bias dropped: a constant added to every score cancels in softmax.
    att2 = (decoder_hidden @ params["w_dec_w"].T
            + params["w_dec_b"] + params["w_enc_b"]).astype(jnp.float32)   # (B, A)
    att2 = jnp.pad(att2, ((0, B_pad - B), (0, A_pad - A)))

    wenc_t = jnp.pad(params["w_enc_w"].T,
                     ((0, 0), (0, A_pad - A))).astype(stream_dtype)        # (E, A_pad)
    wfull = jnp.pad(params["full_att_w"],
                    ((0, 0), (0, A_pad - A))).astype(jnp.float32)          # (1, A_pad)

    # Stream the big operand in bf16 (halves the HBM-bound encoder traffic).
    enc = jnp.pad(encoder_out,
                  ((0, B_pad - B), (0, N_pad - N), (0, 0))).astype(stream_dtype)

    kernel = functools.partial(_bahdanau_kernel, actual_n=N)

    ctx, attw = pl.pallas_call(
        kernel,
        out_shape=(
            jax.ShapeDtypeStruct((B_pad, E), encoder_out.dtype),
            jax.ShapeDtypeStruct((B_pad, N_pad), encoder_out.dtype),
        ),
        grid_spec=pltpu.PrefetchScalarGridSpec(
            num_scalar_prefetch=0,
            grid=grid,
            in_specs=[
                pl.BlockSpec((block_b, N_pad, E), lambda b: (b, 0, 0)),  # encoder block
                pl.BlockSpec((block_b, A_pad), lambda b: (b, 0)),        # hoisted att2
                pl.BlockSpec((E, A_pad), lambda b: (0, 0)),              # W_enc^T (resident)
                pl.BlockSpec((1, A_pad), lambda b: (0, 0)),              # full_att weight
            ],
            out_specs=[
                pl.BlockSpec((block_b, E), lambda b: (b, 0)),            # context
                pl.BlockSpec((block_b, N_pad), lambda b: (b, 0)),        # attention weights
            ],
        ),
        compiler_params=pltpu.CompilerParams(
            dimension_semantics=("parallel",),
            vmem_limit_bytes=48 * 1024 * 1024,
        ),
    )(enc, att2, wenc_t, wfull)

    return ctx[:B], attw[:B, :N]


def _reference(encoder_out, decoder_hidden, params):
    att1 = encoder_out @ params["w_enc_w"].T + params["w_enc_b"]
    att2 = decoder_hidden @ params["w_dec_w"].T + params["w_dec_b"]
    hidden = jnp.tanh(att1 + att2[:, None, :])
    scores = (hidden @ params["full_att_w"].T + params["full_att_b"])[..., 0]
    w = jax.nn.softmax(scores, axis=1)
    ctx = jnp.sum(encoder_out * w[..., None], axis=1)
    return ctx, w


if __name__ == "__main__":
    B, N, E, A = 2, 16, 32, 32     # batch, num locations, encoder_dim, attention_dim

    key = jax.random.PRNGKey(0)
    keys = jax.random.split(key, 8)
    encoder_out = jax.random.normal(keys[0], (B, N, E), dtype=jnp.float32)
    decoder_hidden = jax.random.normal(keys[1], (B, A), dtype=jnp.float32)

    params = {
        "w_enc_w": 0.1 * jax.random.normal(keys[2], (A, E), dtype=jnp.float32),
        "w_enc_b": 0.1 * jax.random.normal(keys[3], (A,), dtype=jnp.float32),
        "w_dec_w": 0.1 * jax.random.normal(keys[4], (A, A), dtype=jnp.float32),
        "w_dec_b": 0.1 * jax.random.normal(keys[5], (A,), dtype=jnp.float32),
        "full_att_w": 0.1 * jax.random.normal(keys[6], (1, A), dtype=jnp.float32),
        "full_att_b": 0.1 * jax.random.normal(keys[7], (1,), dtype=jnp.float32),
    }

    # Default bandwidth-optimized path (encoder stream in bf16).
    ctx, attw = bahdanau_attention(encoder_out, decoder_hidden, params)
    jax.block_until_ready((ctx, attw))

    ctx_ref, attw_ref = _reference(encoder_out, decoder_hidden, params)
    assert ctx.shape == (B, E) and attw.shape == (B, N)

    # f32-streamed run checks the kernel math exactly (no bf16 rounding).
    ctx32, attw32 = bahdanau_attention(encoder_out, decoder_hidden, params,
                                       stream_dtype=jnp.float32)
    jax.block_until_ready((ctx32, attw32))
    assert jnp.allclose(ctx32, ctx_ref, atol=1e-4, rtol=1e-4)
    assert jnp.allclose(attw32, attw_ref, atol=1e-4, rtol=1e-4)

    # bf16-streamed run: tolerance reflects bf16 rounding of encoder_out / W_enc only
    # (softmax normalization is exact; weights sum to 1).
    assert jnp.allclose(ctx, ctx_ref, atol=2e-2, rtol=2e-2)
    assert jnp.allclose(attw, attw_ref, atol=2e-2, rtol=2e-2)

    print("KERNEL_OK")
</pallas_src>

<mosaic_0001>
module attributes {stable_mosaic.version = 11 : i64} {
  func.func @_bahdanau_kernel(%arg0: i32, %arg1: memref<8x16x32xbf16, #tpu.memory_space<vmem>>, %arg2: memref<8x128xf32, #tpu.memory_space<vmem>>, %arg3: memref<32x128xbf16, #tpu.memory_space<vmem>>, %arg4: memref<1x128xf32, #tpu.memory_space<vmem>>, %arg5: memref<8x32xf32, #tpu.memory_space<vmem>>, %arg6: memref<8x16xf32, #tpu.memory_space<vmem>>) attributes {dimension_semantics = [#tpu.dimension_semantics<parallel>], iteration_bounds = array<i64: 1>, scalar_prefetch = 0 : i64, scratch_operands = 0 : i64, tpu.core_type = #tpu.core_type<tc>, window_params = [{transform_indices = @transform_0, window_bounds = array<i64: 8, 16, 32>}, {transform_indices = @transform_1, window_bounds = array<i64: 8, 128>}, {pipeline_mode = #tpu.pipeline_mode<synchronous>, transform_indices = @transform_2, window_bounds = array<i64: 32, 128>}, {pipeline_mode = #tpu.pipeline_mode<synchronous>, transform_indices = @transform_3, window_bounds = array<i64: 1, 128>}, {transform_indices = @transform_4, window_bounds = array<i64: 8, 32>}, {transform_indices = @transform_5, window_bounds = array<i64: 8, 16>}]} {
    %c0 = arith.constant 0 : index
    %c0_0 = arith.constant 0 : index
    %c0_1 = arith.constant 0 : index
    %0 = vector.load %arg1[%c0, %c0_0, %c0_1] : memref<8x16x32xbf16, #tpu.memory_space<vmem>>, vector<8x16x32xbf16>
    %1 = vector.shape_cast %0 : vector<8x16x32xbf16> to vector<128x32xbf16>
    %c0_2 = arith.constant 0 : index
    %c0_3 = arith.constant 0 : index
    %2 = vector.load %arg3[%c0_2, %c0_3] : memref<32x128xbf16, #tpu.memory_space<vmem>>, vector<32x128xbf16>
    %cst = arith.constant dense<0.000000e+00> : vector<128x128xf32>
    %3 = tpu.matmul %1, %2, %cst {dimension_numbers = #tpu.dot_dimension_numbers<[1], [0], [0], [1], [0, 0, 1, 1], [], []>} : vector<128x32xbf16>, vector<32x128xbf16>, vector<128x128xf32> -> vector<128x128xf32>
    %4 = vector.shape_cast %3 : vector<128x128xf32> to vector<8x16x128xf32>
    %c0_4 = arith.constant 0 : index
    %c0_5 = arith.constant 0 : index
    %5 = vector.load %arg2[%c0_4, %c0_5] : memref<8x128xf32, #tpu.memory_space<vmem>>, vector<8x128xf32>
    %6 = vector.shape_cast %5 : vector<8x128xf32> to vector<8x1x128xf32>
    %7 = vector.broadcast %6 : vector<8x1x128xf32> to vector<8x16x128xf32>
    %8 = arith.addf %4, %7 : vector<8x16x128xf32>
    %9 = math.tanh %8 : vector<8x16x128xf32>
    %c0_6 = arith.constant 0 : index
    %c0_7 = arith.constant 0 : index
    %10 = vector.load %arg4[%c0_6, %c0_7] : memref<1x128xf32, #tpu.memory_space<vmem>>, vector<1x128xf32>
    %11 = vector.shape_cast %10 : vector<1x128xf32> to vector<1x1x128xf32>
    %12 = vector.broadcast %11 : vector<1x1x128xf32> to vector<8x16x128xf32>
    %13 = arith.mulf %9, %12 : vector<8x16x128xf32>
    %cst_8 = arith.constant dense<0.000000e+00> : vector<8x16xf32>
    %14 = vector.multi_reduction <add>, %13, %cst_8 [2] : vector<8x16x128xf32> to vector<8x16xf32>
    %cst_9 = arith.constant dense<0xFF800000> : vector<8xf32>
    %15 = vector.multi_reduction <maximumf>, %14, %cst_9 [1] : vector<8x16xf32> to vector<8xf32>
    %16 = vector.shape_cast %15 : vector<8xf32> to vector<8x1xf32>
    %17 = vector.broadcast %16 : vector<8x1xf32> to vector<8x16xf32>
    %18 = arith.subf %14, %17 : vector<8x16xf32>
    %19 = math.exp %18 : vector<8x16xf32>
    %cst_10 = arith.constant dense<0.000000e+00> : vector<8xf32>
    %20 = vector.multi_reduction <add>, %19, %cst_10 [1] : vector<8x16xf32> to vector<8xf32>
    %21 = vector.shape_cast %20 : vector<8xf32> to vector<8x1xf32>
    %22 = vector.broadcast %21 : vector<8x1xf32> to vector<8x16xf32>
    %23 = arith.divf %19, %22 : vector<8x16xf32>
    %c0_11 = arith.constant 0 : index
    %c0_12 = arith.constant 0 : index
    %24 = vector.load %arg6[%c0_11, %c0_12] : memref<8x16xf32, #tpu.memory_space<vmem>>, vector<8x16xf32>
    tpu.vector_store %arg6[%c0_11, %c0_12], %23 {strides = array<i32>} : memref<8x16xf32, #tpu.memory_space<vmem>>, vector<8x16xf32>,
    %25 = arith.extf %0 : vector<8x16x32xbf16> to vector<8x16x32xf32>
    %26 = vector.shape_cast %23 : vector<8x16xf32> to vector<8x16x1xf32>
    %27 = vector.broadcast %26 : vector<8x16x1xf32> to vector<8x16x32xf32>
    %28 = arith.mulf %25, %27 : vector<8x16x32xf32>
    %cst_13 = arith.constant dense<0.000000e+00> : vector<8x32xf32>
    %29 = vector.multi_reduction <add>, %28, %cst_13 [1] : vector<8x16x32xf32> to vector<8x32xf32>
    %c0_14 = arith.constant 0 : index
    %c0_15 = arith.constant 0 : index
    %30 = vector.load %arg5[%c0_14, %c0_15] : memref<8x32xf32, #tpu.memory_space<vmem>>, vector<8x32xf32>
    tpu.vector_store %arg5[%c0_14, %c0_15], %29 {strides = array<i32>} : memref<8x32xf32, #tpu.memory_space<vmem>>, vector<8x32xf32>,
    return
  }
  func.func @transform_0(%arg0: i32) -> (i32, i32, i32) {
    %c0_i32 = arith.constant 0 : i32
    %c0_i32_0 = arith.constant 0 : i32
    %c0_i32_1 = arith.constant 0 : i32
    return %arg0, %c0_i32, %c0_i32_0 : i32, i32, i32
  }
  func.func @transform_1(%arg0: i32) -> (i32, i32) {
    %c0_i32 = arith.constant 0 : i32
    %c0_i32_0 = arith.constant 0 : i32
    return %arg0, %c0_i32 : i32, i32
  }
  func.func @transform_2(%arg0: i32) -> (i32, i32) {
    %c0_i32 = arith.constant 0 : i32
    %c0_i32_0 = arith.constant 0 : i32
    %c0_i32_1 = arith.constant 0 : i32
    return %c0_i32, %c0_i32_0 : i32, i32
  }
  func.func @transform_3(%arg0: i32) -> (i32, i32) {
    %c0_i32 = arith.constant 0 : i32
    %c0_i32_0 = arith.constant 0 : i32
    %c0_i32_1 = arith.constant 0 : i32
    return %c0_i32, %c0_i32_0 : i32, i32
  }
  func.func @transform_4(%arg0: i32) -> (i32, i32) {
    %c0_i32 = arith.constant 0 : i32
    %c0_i32_0 = arith.constant 0 : i32
    return %arg0, %c0_i32 : i32, i32
  }
  func.func @transform_5(%arg0: i32) -> (i32, i32) {
    %c0_i32 = arith.constant 0 : i32
    %c0_i32_0 = arith.constant 0 : i32
    return %arg0, %c0_i32 : i32, i32
  }
}

</mosaic_0001>

<bundles_post_ra>
// kernel: tpu_custom_call.1
= control target key start
LH: loop header
LB: loop body
LE: loop exit
PB: predicated region body
PF: predicated region fallthrough
CT: control target
= control target key end

     0   :  { %11 = vsyncpa [#allocation3], 0  ;;  %s1973_s0 = inlined_call_operand.hbm [shape: bf16[8,16,32], index: 0, kind: input, shape index: {}]   ;;  %s1974_s1 = inlined_call_operand.hbm [shape: f32[8,128], index: 1, kind: input, shape index: {}]   ;;  %s1975_s2 = inlined_call_operand.hbm [shape: bf16[32,128], index: 2, kind: input, shape index: {}]   ;;  %s1976_s3 = inlined_call_operand.vmem [shape: f32[1,128], index: 3, kind: input, shape index: {}]   ;;  %s1977_s4 = inlined_call_operand.hbm [shape: f32[8,32], index: 4, kind: output, shape index: {0}]   ;;  %s1978_s5 = inlined_call_operand.hbm [shape: f32[8,16], index: 5, kind: output, shape index: {1}]  }
   0x1   :  { %12 = vsyncpa [#allocation6], 0 }
   0x2   :  { %13 = vsyncpa [#allocation4], 0 }
   0x3   :  { %14 = vsyncpa [#allocation10], 0  ;;  %s1438_s18 = smov [#allocation5]   ;;  %s1439_s20 = smov [#allocation2]  }
   0x4   :  { %s33_s19 = sshll.u32 %s1438_s18, 4  ;;  %s20_s21 = sshll.u32 %s1439_s20, 4  ;;  %s34_s19 = int_to_ptr.vmem [resolvable:$true] %s33_s19  ;;  %s1477_s21 = int_to_ptr.vmem [resolvable:$true] %s20_s21 }
   0x5   :  { %s1320_s24 = scalar_lea.hbm %s1974_s1, 128 }
   0x6   :  { %p1321_p0 = scmp.ne.s32.totalorder %s1974_s1, %s1320_s24  ;;  %p1324_p1 = scmp.lt.u32.totalorder %s1320_s24, %s1974_s1 }
   0x8   :  { %p1326_p2 = pnand %p1324_p1, %p1321_p0 }
   0xa   :  { %1329 = shalt.err (!%p1326_p2)
}
   0xb   :  { %s1330_s29 = scalar_lea.vmem %s34_s19, 128  ;;  %p1335_p4 = scmp.lt.s32.totalorder %s34_s19, %s34_s19 }
   0xc   :  { %p1331_p3 = scmp.ne.s32.totalorder %s34_s19, %s1330_s29  ;;  %p1336_p5 = scmp.lt.s32.totalorder %s1330_s29, %s1330_s29 }
   0xe   :  { %p1337_p6 = por %p1336_p5, %p1335_p4 }
  0x10   :  { %p1338_p7 = pnand %p1337_p6, %p1331_p3 }
  0x12   :  { %1341 = shalt.err (!%p1338_p7)
}
  0x13   :  { %36 = dma.hbm_to_vmem [thread:$0]  %s1974_s1, 128, %s34_s19, [#allocation6]  }
  0x14   :  { %s1342_s9 = scalar_lea.hbm %s1973_s0, 1024 }
  0x15   :  { %p1343_p8 = scmp.ne.s32.totalorder %s1973_s0, %s1342_s9  ;;  %p1346_p9 = scmp.lt.u32.totalorder %s1342_s9, %s1973_s0 }
  0x17   :  { %p1348_p10 = pnand %p1346_p9, %p1343_p8 }
  0x19   :  { %1351 = shalt.err (!%p1348_p10)
}
  0x1a   :  { %s1352_s14 = scalar_lea.vmem %s1477_s21, 1024  ;;  %p1357_p12 = scmp.lt.s32.totalorder %s1477_s21, %s1477_s21 }
  0x1b   :  { %p1353_p11 = scmp.ne.s32.totalorder %s1477_s21, %s1352_s14  ;;  %p1358_p13 = scmp.lt.s32.totalorder %s1352_s14, %s1352_s14 }
  0x1d   :  { %p1359_p0 = por %p1358_p13, %p1357_p12 }
  0x1f   :  { %p1360_p1 = pnand %p1359_p0, %p1353_p11 }
  0x21   :  { %1363 = shalt.err (!%p1360_p1)
}
  0x22   :  { %s1440_s1 = smov 64   ;;  %s1441_s15 = smov 4  }
  0x23   :  { %26 = dma.hbm_to_vmem [thread:$0]  %s1973_s0, 1024, %s1477_s21, [#allocation3], %s1440_s1, %s1440_s1, %s1441_s15  }
  0x24   :  { %s1442_s18 = smov [#allocation7]   ;;  %s1364_s23 = scalar_lea.hbm %s1975_s2, 256 }
  0x25   :  { %s42_s19 = sshll.u32 %s1442_s18, 4  ;;  %p1365_p2 = scmp.ne.s32.totalorder %s1975_s2, %s1364_s23  ;;  %s43_s19 = int_to_ptr.vmem [resolvable:$true] %s42_s19 }
  0x26   :  { %p1368_p3 = scmp.lt.u32.totalorder %s1364_s23, %s1975_s2 }
  0x28   :  { %p1370_p4 = pnand %p1368_p3, %p1365_p2 }
  0x2a   :  { %1373 = shalt.err (!%p1370_p4)
}
  0x2b   :  { %s1374_s28 = scalar_lea.vmem %s43_s19, 256  ;;  %p1379_p6 = scmp.lt.s32.totalorder %s43_s19, %s43_s19 }
  0x2c   :  { %p1375_p5 = scmp.ne.s32.totalorder %s43_s19, %s1374_s28  ;;  %p1380_p7 = scmp.lt.s32.totalorder %s1374_s28, %s1374_s28 }
  0x2e   :  { %p1381_p8 = por %p1380_p7, %p1379_p6 }
  0x30   :  { %p1382_p9 = pnand %p1381_p8, %p1375_p5 }
  0x32   :  { %1385 = shalt.err (!%p1382_p9)
}
  0x33   :  { %48 = dma.hbm_to_vmem [thread:$0]  %s1975_s2, 256, %s43_s19, [#allocation6], %s1440_s1, %s1440_s1, %s1441_s15  }
  0x34   :  { %1430 = dma.done.wait [#allocation3], 1024  }
  0x35   :  { %1431 = vsyncadd [#allocation3], 4294966272 }
  0x36   :  { %1432 = dma.done.wait [#allocation6], 384  }
  0x37   :  { %1433 = vsyncadd [#allocation6], 4294966912  ;;  %v1221_v0 = vld [vmem:[#allocation7] sm:$0xff]   ;;  %v1222_v1 = vld [vmem:[#allocation7 + $0x8] sm:$0xff]   ;;  %vm133_vm0 = vcmask 261120   ;;  %v261_v12 = vlaneseq  ;;  %vm460_vm1 = vcmask 130112  }
  0x38   :  { %1186 = vmatprep.subr.bf16.mxu0 %v1221_v0  ;;  %1206 = vmatprep.subr.bf16.mxu1 %v1221_v0  ;;  %v1520_v2 = vld [vmem:[#allocation2] sm:$0xff]   ;;  %v1524_v4 = vld [vmem:[#allocation2 + $0x8] sm:$0xff]   ;;  %v1528_v6 = vld [vmem:[#allocation2 + $0x10] sm:$0xff]   ;;  %v1443_v10 = vmov 1966171168   ;;  %vm525_vm2 = vcmask 1041409  }
  0x39   :  { %v1522_v3 = vld [vmem:[#allocation2 + $0x20] sm:$0xff]   ;;  %1187 = vmatpush3.bf16.msra.mxu0 %v1221_v0  ;;  %1208 = vmatpush3.bf16.msra.mxu1 %v1221_v0  ;;  %v1526_v5 = vld [vmem:[#allocation2 + $0x28] sm:$0xff]   ;;  %v1530_v7 = vld [vmem:[#allocation2 + $0x30] sm:$0xff]   ;;  %v259_v11 = vunpack.c.l.s4 %v1443_v10  ;;  %v1553_v14 = vshrl.u32 %v261_v12, 7  ;;  %vm527_vm3 = vcmask 1042434   ;;  %vm529_vm4 = vcmask 1043459  }
  0x3a   :  { %1188 = vmatprep.subr.bf16.mxu0 %v1222_v1  ;;  %1207 = vmatprep.subr.bf16.mxu1 %v1222_v1  ;;  %v1542_v8 = vld [vmem:[#allocation2 + $0x18] sm:$0xff]   ;;  %v255_v15 = vld [vmem:[#allocation5] sm:$0xff]  ;;  %vm531_vm5 = vcmask 1044484   ;;  %vm533_vm6 = vcmask 1045509   ;;  %vm535_vm7 = vcmask 1046534   ;;  %vm537_vm8 = vcmask 1047559  }
  0x3b   :  { %1190 = vmatprep.mubr.msk.bf16.mxu0 %vm133_vm0, %v1520_v2  ;;  %1198 = vmatprep.mubr.msk.bf16.mxu1 %vm133_vm0, %v1522_v3  ;;  %v1546_v9 = vld [vmem:[#allocation2 + $0x38] sm:$0xff]   ;;  %v260_v13 = vunpack.c.0.s8 %v259_v11  ;;  %v257_v17 = vcombine.high %v255_v15, %v255_v15  ;;  %v1557_v23 = vsub.s32 0, %v1553_v14  ;;  %v1570_v57 = vld [vmem:[%s1976_s3] ss:$0 sm:$0xff]  ;;  %vm540_vm9 = vcmask 130048   ;;  %s1445_s3 = smov [#allocation9]  }
  0x3c   :  { %s1143_s30 = sshll.u32 %s1445_s3, 4  ;;  %s1144_s30 = int_to_ptr.vmem [resolvable:$true] %s1143_s30 }
  0x3d   :  { %1189 = vmatpush3.bf16.msra.mxu0 %v1222_v1  ;;  %1209 = vmatpush3.bf16.msra.mxu1 %v1222_v1  ;;  %v263_v16 = vsub.s32 %v260_v13, %v1553_v14  ;;  %s1386_s6 = scalar_lea.vmem %s1144_s30, 128  ;;  %p1391_p11 = scmp.lt.s32.totalorder %s1144_s30, %s1144_s30 }
  0x3e   :  { %p1387_p10 = scmp.ne.s32.totalorder %s1144_s30, %s1386_s6  ;;  %p1392_p12 = scmp.lt.s32.totalorder %s1386_s6, %s1386_s6 }
  0x3f   :  { %v264_v18 = vrot.slane %v255_v15, %v263_v16  ;;  %v271_v19 = vrot.slane %v257_v17, %v263_v16 }
  0x40   :  { %1191 = vmatmul.mubr.msk.bf16.vlgmr.msra.gmra.mrb[0].mxu0 %vm133_vm0, %v1524_v4  ;;  %1199 = vmatmul.mubr.msk.bf16.vlgmr.msra.gmra.mrb[0].mxu1 %vm133_vm0, %v1526_v5  ;;  %p1393_p13 = por %p1392_p12, %p1391_p11 }
  0x41   :  { %1194 = vmatprep.mubr.msk.bf16.mxu0 %vm133_vm0, %v1528_v6  ;;  %1202 = vmatprep.mubr.msk.bf16.mxu1 %vm133_vm0, %v1530_v7  ;;  %v272_v20 = vcombine.high %v264_v18, %v264_v18  ;;  %v273_v21 = vcombine.high %v271_v19, %v271_v19  ;;  %v280_v25 = vrot.slane %v264_v18, %v263_v16 }
  0x42   :  { %v287_v29 = vrot.slane %v271_v19, %v263_v16  ;;  %p1394_p0 = pnand %p1393_p13, %p1387_p10 }
  0x43   :  { %v294_v22 = vrot.slane %v272_v20, %v263_v16  ;;  %v1559_v24 = vrot.slane %v273_v21, %v263_v16  ;;  %v309_v28 = vrot.slane %v280_v25, %v1557_v23  ;;  %v302_v51 = vcombine.high %v280_v25, %v280_v25 }
  0x44   :  { %v325_v37 = vrot.slane %v287_v29, %v1557_v23  ;;  %v303_v62 = vcombine.high %v287_v29, %v287_v29 }
  0x45   :  { %v313_v26 = vrot.slane %v294_v22, %v1557_v23  ;;  %v329_v27 = vrot.slane %v1559_v24, %v1557_v23  ;;  %v304_v44 = vcombine.high %v294_v22, %v294_v22  ;;  %v317_v60 = vrot.slane %v302_v51, %v1557_v23 }
  0x46   :  { %v305_v16 = vcombine.high %v1559_v24, %v1559_v24  ;;  %v333_v17 = vrot.slane %v303_v62, %v1557_v23 }
  0x47   :  { %v321_v49 = vrot.slane %v304_v44, %v1557_v23 }
  0x48   :  { %1195 = vmatmul.mubr.msk.bf16.gmra.mrb[4].mxu0 %vm133_vm0, %v1542_v8  ;;  %1203 = vmatmul.mubr.msk.bf16.gmra.mrb[4].mxu1 %vm133_vm0, %v1546_v9  ;;  %v337_v25 = vrot.slane %v305_v16, %v1557_v23 }
 0x113   :  { %v1192_v30 = vpop.f32.mrb[0].mxu0  ;;  %v1200_v31 = vpop.f32.mrb[0].mxu1 }
 0x114   :  { %v348_v32 = vadd.f32 %v1192_v30, %v313_v26  ;;  %v356_v33 = vadd.f32 %v1200_v31, %v329_v27  ;;  %v192_v34 = vpop.f32.mrb[1].mxu0  ;;  %v224_v35 = vpop.f32.mrb[1].mxu1 }
 0x115   :  { %v346_v36 = vadd.f32 %v309_v28, %v192_v34  ;;  %v1193_v38 = vpop.f32.mrb[2].mxu0  ;;  %v1201_v39 = vpop.f32.mrb[2].mxu1  ;;  %v354_v45 = vadd.f32 %v325_v37, %v224_v35 }
 0x116   :  { %1240 = vtanh.f32 %v348_v32  ;;  %v349_v40 = vadd.f32 %v1193_v38, %v313_v26  ;;  %v195_v41 = vpop.f32.mrb[3].mxu0  ;;  %v227_v42 = vpop.f32.mrb[3].mxu1  ;;  %v357_v43 = vadd.f32 %v1201_v39, %v329_v27 }
 0x117   :  { %1242 = vtanh.f32 %v356_v33  ;;  %v355_v48 = vadd.f32 %v325_v37, %v227_v42  ;;  %v347_v53 = vadd.f32 %v309_v28, %v195_v41 }
 0x118   :  { %1244 = vtanh.f32 %v346_v36 }
 0x119   :  { %1246 = vtanh.f32 %v349_v40 }
 0x11a   :  { %1248 = vtanh.f32 %v357_v43 }
 0x11b   :  { %v1196_v46 = vpop.f32.mrb[4].mxu0  ;;  %v1204_v47 = vpop.f32.mrb[4].mxu1  ;;  %1250 = vtanh.f32 %v354_v45 }
 0x11c   :  { %v208_v50 = vpop.f32.mrb[5].mxu0  ;;  %v240_v52 = vpop.f32.mrb[5].mxu1  ;;  %1252 = vtanh.f32 %v355_v48  ;;  %v352_v0 = vadd.f32 %v1196_v46, %v321_v49  ;;  %v360_v32 = vadd.f32 %v1204_v47, %v337_v25 }
 0x11d   :  { %v1197_v54 = vpop.f32.mrb[6].mxu0  ;;  %v1205_v55 = vpop.f32.mrb[6].mxu1  ;;  %1254 = vtanh.f32 %v347_v53  ;;  %v350_v18 = vadd.f32 %v317_v60, %v208_v50  ;;  %v358_v27 = vadd.f32 %v333_v17, %v240_v52 }
 0x11e   :  { %v211_v56 = vpop.f32.mrb[7].mxu0  ;;  %v243_v58 = vpop.f32.mrb[7].mxu1  ;;  %v353_v61 = vadd.f32 %v1197_v54, %v321_v49  ;;  %v361_v31 = vadd.f32 %v1205_v55, %v337_v25 }
 0x11f   :  { %v351_v15 = vadd.f32 %v317_v60, %v211_v56  ;;  %v359_v26 = vadd.f32 %v333_v17, %v243_v58  ;;  %v450_v56 = vand.u32 127, %v261_v12 }
 0x120   :  { %v1241_v59 = vpop.eup %1240  ;;  %1256 = vtanh.f32 %v353_v61 }
 0x121   :  { %v1243_v63 = vpop.eup %1242  ;;  %v387_v1 = vmul.f32 %v1241_v59, %v1570_v57  ;;  %1258 = vtanh.f32 %v352_v0  ;;  %v455_v59 = vadd.s32 4294967288, %v450_v56  ;;  %v1614_v62 = vsub.s32 %v450_v56, %v1553_v14 }
 0x122   :  { %v395_v10 = vmul.f32 %v1243_v63, %v1570_v57  ;;  %v1245_v11 = vpop.eup %1244  ;;  %1260 = vtanh.f32 %v351_v15 }
 0x123   :  { %405 = vadd.xlane.f32.xlu1 %v387_v1  ;;  %v1247_v13 = vpop.eup %1246  ;;  %v385_v21 = vmul.f32 %v1245_v11, %v1570_v57  ;;  %1262 = vtanh.f32 %v350_v18  ;;  %v1611_v61 = vsub.s32 %v455_v59, %v1553_v14 }
 0x124   :  { %421 = vadd.xlane.f32.xlu0 %v395_v10  ;;  %v388_v19 = vmul.f32 %v1247_v13, %v1570_v57  ;;  %v1249_v20 = vpop.eup %1248  ;;  %1264 = vtanh.f32 %v359_v26 }
 0x125   :  { %v1251_v22 = vpop.eup %1250  ;;  %v396_v24 = vmul.f32 %v1249_v20, %v1570_v57  ;;  %1266 = vtanh.f32 %v358_v27 }
 0x126   :  { %v1253_v28 = vpop.eup %1252  ;;  %v393_v29 = vmul.f32 %v1251_v22, %v1570_v57  ;;  %1268 = vtanh.f32 %v361_v31 }
 0x127   :  { %407 = vadd.xlane.f32.xlu1 %v388_v19  ;;  %v1255_v30 = vpop.eup %1254  ;;  %v394_v33 = vmul.f32 %v1253_v28, %v1570_v57  ;;  %1270 = vtanh.f32 %v360_v32 }
 0x128   :  { %401 = vadd.xlane.f32.xlu0 %v385_v21  ;;  %v386_v35 = vmul.f32 %v1255_v30, %v1570_v57 }
 0x12a   :  { %v1257_v34 = vpop.eup %1256 }
 0x12b   :  { %423 = vadd.xlane.f32.xlu1 %v396_v24  ;;  %v1259_v36 = vpop.eup %1258  ;;  %v392_v37 = vmul.f32 %v1257_v34, %v1570_v57 }
 0x12c   :  { %417 = vadd.xlane.f32.xlu0 %v393_v29  ;;  %v1261_v38 = vpop.eup %1260  ;;  %v391_v39 = vmul.f32 %v1259_v36, %v1570_v57 }
 0x12d   :  { %v1263_v40 = vpop.eup %1262  ;;  %v390_v41 = vmul.f32 %v1261_v38, %v1570_v57 }
 0x12e   :  { %v1265_v42 = vpop.eup %1264  ;;  %v389_v43 = vmul.f32 %v1263_v40, %v1570_v57 }
 0x12f   :  { %419 = vadd.xlane.f32.xlu1 %v394_v33  ;;  %v1267_v44 = vpop.eup %1266  ;;  %v398_v45 = vmul.f32 %v1265_v42, %v1570_v57 }
 0x130   :  { %403 = vadd.xlane.f32.xlu0 %v386_v35  ;;  %v1269_v46 = vpop.eup %1268  ;;  %v397_v47 = vmul.f32 %v1267_v44, %v1570_v57 }
 0x131   :  { %v1271_v48 = vpop.eup %1270  ;;  %v400_v49 = vmul.f32 %v1269_v46, %v1570_v57 }
 0x132   :  { %v399_v50 = vmul.f32 %v1271_v48, %v1570_v57 }
 0x133   :  { %415 = vadd.xlane.f32.xlu1 %v392_v37 }
 0x134   :  { %413 = vadd.xlane.f32.xlu0 %v391_v39 }
 0x137   :  { %411 = vadd.xlane.f32.xlu1 %v390_v41 }
 0x138   :  { %409 = vadd.xlane.f32.xlu0 %v389_v43 }
 0x13b   :  { %427 = vadd.xlane.f32.xlu1 %v398_v45 }
 0x13c   :  { %425 = vadd.xlane.f32.xlu0 %v397_v47 }
 0x13f   :  { %431 = vadd.xlane.f32.xlu1 %v400_v49  ;;  %v1444_v49 = vmov 0  }
 0x140   :  { %429 = vadd.xlane.f32.xlu0 %v399_v50  ;;  %1219 = vset.pattern.permute.xlu1 %v1444_v49  ;;  %v551_v50 = vsub.s32 1, %v1553_v14 }
 0x141   :  { %1220 = vset.pattern.permute.xlu0 %v1444_v49 }
 0x1b0   :  { %v1593_v51 = vpop.xlane.xlu1 %405 }
 0x1b1   :  { %v1595_v52 = vpop.xlane.xlu0 %421  ;;  %v465_v11 = vrot.slane %v1593_v51, %v1614_v62 }
 0x1b2   :  { %v501_v33 = vrot.slane %v1595_v52, %v1614_v62 }
 0x1b4   :  { %v1597_v53 = vpop.xlane.xlu1 %407 }
 0x1b5   :  { %v1599_v54 = vpop.xlane.xlu0 %401  ;;  %v469_v10 = vrot.slane %v1597_v53, %v1611_v61 }
 0x1b6   :  { %v454_v12 = vrot.slane %v1599_v54, %v1614_v62 }
 0x1b7   :  { %v470_v22 = vsel %vm460_vm1, %v469_v10, %v465_v11 }
 0x1b8   :  { %v1601_v55 = vpop.xlane.xlu1 %423 }
 0x1b9   :  { %v1604_v58 = vpop.xlane.xlu0 %417  ;;  %v505_v26 = vrot.slane %v1601_v55, %v1611_v61 }
 0x1ba   :  { %v492_v25 = vrot.slane %v1604_v58, %v1614_v62 }
 0x1bb   :  { %v506_v38 = vsel %vm460_vm1, %v505_v26, %v501_v33 }
 0x1bc   :  { %v1606_v60 = vpop.xlane.xlu1 %419 }
 0x1bd   :  { %v1608_v57 = vpop.xlane.xlu0 %403  ;;  %v496_v20 = vrot.slane %v1606_v60, %v1611_v61 }
 0x1be   :  { %v459_v0 = vrot.slane %v1608_v57, %v1611_v61 }
 0x1bf   :  { %v497_v34 = vsel %vm460_vm1, %v496_v20, %v492_v25 }
 0x1c0   :  { %v1616_v63 = vpop.xlane.xlu1 %415  ;;  %v461_v15 = vsel %vm460_vm1, %v459_v0, %v454_v12  ;;  %v567_v12 = vsub.s32 5, %v1553_v14 }
 0x1c1   :  { %v1620_v1 = vpop.xlane.xlu0 %413  ;;  %v487_v17 = vrot.slane %v1616_v63, %v1611_v61  ;;  %v526_v27 = vsel %vm525_vm2, %v470_v22, %v461_v15  ;;  %v555_v15 = vsub.s32 2, %v1553_v14 }
 0x1c2   :  { %v483_v16 = vrot.slane %v1620_v1, %v1614_v62 }
 0x1c4   :  { %v1628_v13 = vpop.xlane.xlu1 %411  ;;  %v488_v29 = vsel %vm460_vm1, %v487_v17, %v483_v16  ;;  %v571_v17 = vsub.s32 6, %v1553_v14 }
 0x1c5   :  { %v1635_v18 = vpop.xlane.xlu0 %409  ;;  %v478_v19 = vrot.slane %v1628_v13, %v1611_v61 }
 0x1c6   :  { %v474_v21 = vrot.slane %v1635_v18, %v1614_v62 }
 0x1c8   :  { %v479_v24 = vsel %vm460_vm1, %v478_v19, %v474_v21  ;;  %v1650_v28 = vpop.xlane.xlu1 %427 }
 0x1c9   :  { %v528_v30 = vsel %vm527_vm3, %v479_v24, %v526_v27  ;;  %v426_v31 = vpop.xlane.xlu0 %425  ;;  %v514_v32 = vrot.slane %v1650_v28, %v1611_v61  ;;  %v559_v27 = vsub.s32 3, %v1553_v14 }
 0x1ca   :  { %v510_v35 = vrot.slane %v426_v31, %v1614_v62  ;;  %v530_v36 = vsel %vm529_vm4, %v488_v29, %v528_v30 }
 0x1cb   :  { %v532_v37 = vsel %vm531_vm5, %v497_v34, %v530_v36 }
 0x1cc   :  { %v1663_v39 = vpop.xlane.xlu1 %431  ;;  %v515_v42 = vsel %vm460_vm1, %v514_v32, %v510_v35  ;;  %v534_v43 = vsel %vm533_vm6, %v506_v38, %v532_v37  ;;  %v563_v38 = vsub.s32 4, %v1553_v14 }
 0x1cd   :  { %v430_v40 = vpop.xlane.xlu0 %429  ;;  %v523_v41 = vrot.slane %v1663_v39, %v1611_v61  ;;  %v536_v46 = vsel %vm535_vm7, %v515_v42, %v534_v43 }
 0x1ce   :  { %v519_v44 = vrot.slane %v430_v40, %v1614_v62 }
 0x1d0   :  { %v524_v45 = vsel %vm460_vm1, %v523_v41, %v519_v44 }
 0x1d1   :  { %v538_v47 = vsel %vm537_vm8, %v524_v45, %v536_v46 }
 0x1d2   :  { %v541_v48 = vsel %vm540_vm9, %v538_v47, -inf }
 0x1d3   :  { %542 = vmax.xlane.f32.xlu0 %v541_v48 }
 0x260   :  { %v543_v56 = vpop.xlane.xlu0 %542 }
 0x261   :  { %v548_v59 = vrot.slane %v543_v56, %v1557_v23  ;;  %v552_v0 = vrot.slane %v543_v56, %v551_v50  ;;  %v1686_v19 = vrot.slane %v543_v56, %v567_v12  ;;  %v556_v22 = vrot.slane %v543_v56, %v555_v15 }
 0x262   :  { %v560_v33 = vrot.slane %v543_v56, %v559_v27 }
 0x263   :  { %v585_v10 = vsub.f32 %v1599_v54, %v548_v59  ;;  %v586_v11 = vsub.f32 %v1608_v57, %v548_v59  ;;  %v587_v16 = vsub.f32 %v1593_v51, %v552_v0  ;;  %v588_v25 = vsub.f32 %v1597_v53, %v552_v0 }
 0x264   :  { %v575_v57 = vsub.s32 7, %v1553_v14  ;;  %v1694_v51 = vrot.slane %v543_v56, %v571_v17  ;;  %v595_v26 = vsub.f32 %v1595_v52, %v1686_v19  ;;  %v589_v24 = vsub.f32 %v1635_v18, %v556_v22 }
 0x265   :  { %v601_v20 = vmul.f32 1.442695, %v585_v10  ;;  %v603_v21 = vmul.f32 1.442695, %v586_v11  ;;  %v605_v54 = vmul.f32 1.442695, %v587_v16  ;;  %v590_v34 = vsub.f32 %v1628_v13, %v556_v22 }
 0x266   :  { %v607_v29 = vmul.f32 1.442695, %v588_v25  ;;  %v576_v53 = vrot.slane %v543_v56, %v575_v57  ;;  %v597_v30 = vsub.f32 %v426_v31, %v1694_v51  ;;  %v621_v32 = vmul.f32 1.442695, %v595_v26 }
 0x267   :  { %1272 = vpow2.f32 %v601_v20  ;;  %v609_v35 = vmul.f32 1.442695, %v589_v24  ;;  %v591_v31 = vsub.f32 %v1620_v1, %v560_v33  ;;  %v611_v41 = vmul.f32 1.442695, %v590_v34 }
 0x268   :  { %1274 = vpow2.f32 %v603_v21  ;;  %v599_v36 = vsub.f32 %v430_v40, %v576_v53  ;;  %v625_v18 = vmul.f32 1.442695, %v597_v30  ;;  %v564_v40 = vrot.slane %v543_v56, %v563_v38 }
 0x269   :  { %1276 = vpow2.f32 %v605_v54  ;;  %v592_v43 = vsub.f32 %v1616_v63, %v560_v33  ;;  %v613_v44 = vmul.f32 1.442695, %v591_v31  ;;  %v596_v0 = vsub.f32 %v1601_v55, %v1686_v19 }
 0x26a   :  { %1278 = vpow2.f32 %v607_v29  ;;  %v629_v42 = vmul.f32 1.442695, %v599_v36  ;;  %v593_v46 = vsub.f32 %v1604_v58, %v564_v40  ;;  %v594_v49 = vsub.f32 %v1606_v60, %v564_v40 }
 0x26b   :  { %1280 = vpow2.f32 %v621_v32  ;;  %v615_v47 = vmul.f32 1.442695, %v592_v43  ;;  %v598_v60 = vsub.f32 %v1650_v28, %v1694_v51  ;;  %v623_v16 = vmul.f32 1.442695, %v596_v0 }
 0x26c   :  { %1282 = vpow2.f32 %v609_v35  ;;  %v617_v56 = vmul.f32 1.442695, %v593_v46  ;;  %v619_v10 = vmul.f32 1.442695, %v594_v49  ;;  %v600_v21 = vsub.f32 %v1663_v39, %v576_v53 }
 0x26d   :  { %1284 = vpow2.f32 %v625_v18  ;;  %v627_v55 = vmul.f32 1.442695, %v598_v60 }
 0x26e   :  { %1286 = vpow2.f32 %v611_v41  ;;  %v631_v22 = vmul.f32 1.442695, %v600_v21 }
 0x26f   :  { %1288 = vpow2.f32 %v629_v42 }
 0x270   :  { %1290 = vpow2.f32 %v613_v44 }
 0x271   :  { %v1706_v52 = vpop.eup %1272  ;;  %1292 = vpow2.f32 %v615_v47 }
 0x272   :  { %v1708_v37 = vpop.eup %1274  ;;  %650 = vperm.xlu1 %1219, %v1706_v52   ;;  %1294 = vpow2.f32 %v617_v56 }
 0x273   :  { %653 = vperm.xlu0 %1220, %v1708_v37   ;;  %v1714_v13 = vpop.eup %1276  ;;  %1296 = vpow2.f32 %v619_v10 }
 0x274   :  { %v1720_v45 = vpop.eup %1278  ;;  %1298 = vpow2.f32 %v623_v16 }
 0x275   :  { %v1723_v1 = vpop.eup %1280  ;;  %1300 = vpow2.f32 %v627_v55 }
 0x276   :  { %656 = vperm.xlu1 %1219, %v1714_v13   ;;  %v1727_v48 = vpop.eup %1282  ;;  %1302 = vpow2.f32 %v631_v22 }
 0x277   :  { %680 = vperm.xlu0 %1220, %v1723_v1   ;;  %v1730_v63 = vpop.eup %1284 }
 0x278   :  { %v1734_v59 = vpop.eup %1286 }
 0x279   :  { %v1737_v58 = vpop.eup %1288 }
 0x27a   :  { %659 = vperm.xlu1 %1219, %v1720_v45   ;;  %v1742_v11 = vpop.eup %1290 }
 0x27b   :  { %686 = vperm.xlu0 %1220, %v1730_v63   ;;  %v1747_v20 = vpop.eup %1292 }
 0x27c   :  { %v1751_v19 = vpop.eup %1294 }
 0x27d   :  { %v1754_v25 = vpop.eup %1296 }
 0x27e   :  { %662 = vperm.xlu1 %1219, %v1727_v48   ;;  %v1757_v28 = vpop.eup %1298 }
 0x27f   :  { %692 = vperm.xlu0 %1220, %v1737_v58   ;;  %v1760_v54 = vpop.eup %1300 }
 0x280   :  { %v1763_v39 = vpop.eup %1302 }
 0x282   :  { %665 = vperm.xlu1 %1219, %v1734_v59  }
 0x286   :  { %668 = vperm.xlu1 %1219, %v1742_v11  }
 0x28a   :  { %671 = vperm.xlu1 %1219, %v1747_v20  }
 0x28e   :  { %674 = vperm.xlu1 %1219, %v1751_v19  }
 0x292   :  { %677 = vperm.xlu1 %1219, %v1754_v25  }
 0x296   :  { %683 = vperm.xlu1 %1219, %v1757_v28  }
 0x29a   :  { %689 = vperm.xlu1 %1219, %v1760_v54  }
 0x29e   :  { %695 = vperm.xlu1 %1219, %v1763_v39  }
 0x2f1   :  { %v651_v51 = vpop.permute.xlu1 %650 }
 0x2f2   :  { %v654_v32 = vpop.permute.xlu0 %653  ;;  %v700_v43 = vrot.slane %v651_v51, %v1614_v62 }
 0x2f3   :  { %v704_v40 = vrot.slane %v654_v32, %v1611_v61 }
 0x2f5   :  { %v657_v26 = vpop.permute.xlu1 %656  ;;  %v705_v55 = vsel %vm460_vm1, %v704_v40, %v700_v43 }
 0x2f6   :  { %v681_v35 = vpop.permute.xlu0 %680  ;;  %v709_v44 = vrot.slane %v657_v26, %v1614_v62 }
 0x2f7   :  { %v745_v22 = vrot.slane %v681_v35, %v1614_v62 }
 0x2f9   :  { %v660_v24 = vpop.permute.xlu1 %659 }
 0x2fa   :  { %v713_v18 = vrot.slane %v660_v24, %v1611_v61  ;;  %v687_v31 = vpop.permute.xlu0 %686 }
 0x2fb   :  { %v754_v24 = vrot.slane %v687_v31, %v1614_v62 }
 0x2fc   :  { %v714_v56 = vsel %vm460_vm1, %v713_v18, %v709_v44 }
 0x2fd   :  { %v663_v29 = vpop.permute.xlu1 %662 }
 0x2fe   :  { %v718_v47 = vrot.slane %v663_v29, %v1614_v62  ;;  %v769_v29 = vsel %vm525_vm2, %v714_v56, %v705_v55 }
 0x301   :  { %v666_v53 = vpop.permute.xlu1 %665 }
 0x302   :  { %v722_v41 = vrot.slane %v666_v53, %v1611_v61  ;;  %v693_v53 = vpop.permute.xlu0 %692 }
 0x303   :  { %v763_v18 = vrot.slane %v693_v53, %v1614_v62 }
 0x304   :  { %v723_v60 = vsel %vm460_vm1, %v722_v41, %v718_v47 }
 0x305   :  { %v669_v30 = vpop.permute.xlu1 %668  ;;  %v770_v32 = vsel %vm527_vm3, %v723_v60, %v769_v29 }
 0x306   :  { %v727_v0 = vrot.slane %v669_v30, %v1614_v62 }
 0x309   :  { %v672_v33 = vpop.permute.xlu1 %671 }
 0x30a   :  { %v731_v46 = vrot.slane %v672_v33, %v1611_v61 }
 0x30c   :  { %v732_v51 = vsel %vm460_vm1, %v731_v46, %v727_v0 }
 0x30d   :  { %v675_v34 = vpop.permute.xlu1 %674 }
 0x30e   :  { %v736_v16 = vrot.slane %v675_v34, %v1614_v62  ;;  %v771_v34 = vsel %vm529_vm4, %v732_v51, %v770_v32  ;;  %v992_v32 = vunpack.c.l.bf16 %v1524_v4 }
 0x311   :  { %v678_v36 = vpop.permute.xlu1 %677 }
 0x312   :  { %v740_v49 = vrot.slane %v678_v36, %v1611_v61 }
 0x314   :  { %v741_v30 = vsel %vm460_vm1, %v740_v49, %v736_v16 }
 0x315   :  { %v684_v42 = vpop.permute.xlu1 %683  ;;  %v772_v41 = vsel %vm531_vm5, %v741_v30, %v771_v34 }
 0x316   :  { %v749_v10 = vrot.slane %v684_v42, %v1611_v61 }
 0x318   :  { %v750_v33 = vsel %vm460_vm1, %v749_v10, %v745_v22 }
 0x319   :  { %v690_v21 = vpop.permute.xlu1 %689  ;;  %v773_v42 = vsel %vm533_vm6, %v750_v33, %v772_v41 }
 0x31a   :  { %v758_v26 = vrot.slane %v690_v21, %v1611_v61 }
 0x31c   :  { %v759_v36 = vsel %vm460_vm1, %v758_v26, %v754_v24 }
 0x31d   :  { %v696_v35 = vpop.permute.xlu1 %695  ;;  %v774_v43 = vsel %vm535_vm7, %v759_v36, %v773_v42  ;;  %v994_v36 = vunpack.c.l.bf16 %v1528_v6 }
 0x31e   :  { %v767_v31 = vrot.slane %v696_v35, %v1611_v61 }
 0x320   :  { %v768_v40 = vsel %vm460_vm1, %v767_v31, %v763_v18 }
 0x321   :  { %v775_v44 = vsel %vm537_vm8, %v768_v40, %v774_v43 }
 0x322   :  { %v777_v46 = vsel %vm540_vm9, %v775_v44, 0.0 }
 0x323   :  { %778 = vadd.xlane.f32.xlu0 %v777_v46 }
 0x3b0   :  { %v779_v47 = vpop.xlane.xlu0 %778 }
 0x3b1   :  { %v800_v49 = vrot.slane %v779_v47, %v563_v38  ;;  %v784_v56 = vrot.slane %v779_v47, %v1557_v23  ;;  %v812_v0 = vrot.slane %v779_v47, %v575_v57  ;;  %v788_v10 = vrot.slane %v779_v47, %v551_v50 }
 0x3b2   :  { %v792_v55 = vrot.slane %v779_v47, %v555_v15  ;;  %v796_v50 = vrot.slane %v779_v47, %v559_v27 }
 0x3b3   :  { %1304 = vrcp.f32 %v800_v49 }
 0x3b4   :  { %1306 = vrcp.f32 %v784_v56 }
 0x3b5   :  { %1308 = vrcp.f32 %v812_v0 }
 0x3b6   :  { %1310 = vrcp.f32 %v788_v10 }
 0x3b7   :  { %1312 = vrcp.f32 %v792_v55 }
 0x3b8   :  { %1314 = vrcp.f32 %v796_v50 }
 0x3bd   :  { %v1305_v60 = vpop.eup %1304 }
 0x3be   :  { %v1307_v16 = vpop.eup %1306  ;;  %v834_v21 = vmul.f32 %v1305_v60, %v1751_v19 }
 0x3bf   :  { %v1309_v38 = vpop.eup %1308  ;;  %v822_v23 = vmul.f32 %v1307_v16, %v1706_v52  ;;  %v823_v22 = vmul.f32 %v1307_v16, %v1708_v37  ;;  %v804_v37 = vrot.slane %v779_v47, %v567_v12 }
 0x3c0   :  { %886 = vperm.xlu0 %1220, %v834_v21   ;;  %v843_v57 = vmul.f32 %v1309_v38, %v1737_v58  ;;  %v1311_v51 = vpop.eup %1310  ;;  %v997_v21 = vunpack.c.h.bf16 %v1542_v8 }
 0x3c1   :  { %862 = vperm.xlu1 %1219, %v822_v23   ;;  %v825_v19 = vmul.f32 %v1311_v51, %v1714_v13  ;;  %v826_v15 = vmul.f32 %v1311_v51, %v1720_v45  ;;  %v1313_v52 = vpop.eup %1312  ;;  %1316 = vrcp.f32 %v804_v37  ;;  %v808_v13 = vrot.slane %v779_v47, %v571_v17 }
 0x3c2   :  { %v828_v26 = vmul.f32 %v1313_v52, %v1727_v48  ;;  %v829_v58 = vmul.f32 %v1313_v52, %v1734_v59  ;;  %v1315_v24 = vpop.eup %1314  ;;  %v835_v48 = vmul.f32 %v1305_v60, %v1754_v25  ;;  %v844_v17 = vmul.f32 %v1309_v38, %v1763_v39 }
 0x3c3   :  { %v831_v27 = vmul.f32 %v1315_v24, %v1742_v11  ;;  %v832_v45 = vmul.f32 %v1315_v24, %v1747_v20  ;;  %1318 = vrcp.f32 %v808_v13  ;;  %v998_v38 = vunpack.c.l.bf16 %v1522_v3 }
 0x3c4   :  { %904 = vperm.xlu0 %1220, %v843_v57  }
 0x3c5   :  { %865 = vperm.xlu1 %1219, %v823_v22  }
 0x3c9   :  { %868 = vperm.xlu1 %1219, %v825_v19   ;;  %v999_v19 = vunpack.c.h.bf16 %v1522_v3 }
 0x3cb   :  { %v1317_v29 = vpop.eup %1316 }
 0x3cc   :  { %v837_v12 = vmul.f32 %v1317_v29, %v1723_v1  ;;  %v838_v59 = vmul.f32 %v1317_v29, %v1757_v28  ;;  %v993_v1 = vunpack.c.h.bf16 %v1524_v4  ;;  %v991_v28 = vunpack.c.h.bf16 %v1520_v2 }
 0x3cd   :  { %871 = vperm.xlu1 %1219, %v826_v15   ;;  %v1319_v53 = vpop.eup %1318  ;;  %v995_v4 = vunpack.c.h.bf16 %v1528_v6  ;;  %v996_v6 = vunpack.c.l.bf16 %v1542_v8 }
 0x3ce   :  { %v840_v11 = vmul.f32 %v1319_v53, %v1730_v63  ;;  %v841_v14 = vmul.f32 %v1319_v53, %v1760_v54  ;;  %v990_v63 = vunpack.c.l.bf16 %v1520_v2  ;;  %v1000_v53 = vunpack.c.l.bf16 %v1526_v5 }
 0x3d1   :  { %874 = vperm.xlu1 %1219, %v828_v26  }
 0x3d5   :  { %877 = vperm.xlu1 %1219, %v829_v58  }
 0x3d9   :  { %880 = vperm.xlu1 %1219, %v831_v27  }
 0x3dd   :  { %883 = vperm.xlu1 %1219, %v832_v45  }
 0x3e1   :  { %889 = vperm.xlu1 %1219, %v835_v48  }
 0x3e5   :  { %892 = vperm.xlu1 %1219, %v837_v12  }
 0x3e9   :  { %895 = vperm.xlu1 %1219, %v838_v59  }
 0x3ed   :  { %898 = vperm.xlu1 %1219, %v840_v11  }
 0x3f1   :  { %901 = vperm.xlu1 %1219, %v841_v14  }
 0x3f5   :  { %907 = vperm.xlu1 %1219, %v844_v17  }
 0x43f   :  { %v1865_v22 = vpop.permute.xlu0 %886 }
 0x440   :  { %v1829_v20 = vpop.permute.xlu1 %862  ;;  %v1030_v26 = vmul.f32 %v998_v38, %v1865_v22 }
 0x441   :  { %v1022_v35 = vmul.f32 %v990_v63, %v1829_v20  ;;  %v1001_v63 = vunpack.c.h.bf16 %v1526_v5  ;;  %v912_v5 = vrot.slane %v1829_v20, %v1614_v62 }
 0x442   :  { %v1074_v3 = vsel %vm133_vm0, %v1030_v26, 0.0 }
 0x443   :  { %v1038_v43 = vsel %vm133_vm0, %v1022_v35, 0.0 }
 0x444   :  { %v1831_v25 = vpop.permute.xlu1 %865 }
 0x445   :  { %v1023_v39 = vmul.f32 %v991_v28, %v1831_v25  ;;  %v1004_v28 = vunpack.c.l.bf16 %v1546_v9 }
 0x447   :  { %v1039_v2 = vsel %vm133_vm0, %v1023_v39, 0.0  ;;  %v1885_v39 = vpop.permute.xlu0 %904 }
 0x448   :  { %v1833_v30 = vpop.permute.xlu1 %868  ;;  %v1040_v46 = vadd.f32 %v1039_v2, %v1038_v43 }
 0x449   :  { %v1024_v34 = vmul.f32 %v992_v32, %v1833_v30 }
 0x44a   :  { %v1041_v16 = vrot.slane %v1040_v46, 4 }
 0x44b   :  { %v1047_v31 = vsel %vm133_vm0, %v1024_v34, 0.0  ;;  %v916_v34 = vrot.slane %v1831_v25, %v1611_v61  ;;  %v1036_v25 = vmul.f32 %v1004_v28, %v1885_v39 }
 0x44c   :  { %v1839_v33 = vpop.permute.xlu1 %871  ;;  %v1042_v15 = vadd.f32 %v1041_v16, %v1040_v46 }
 0x44d   :  { %v1025_v54 = vmul.f32 %v993_v1, %v1839_v33 }
 0x44e   :  { %v1043_v45 = vrot.slane %v1042_v15, 2 }
 0x44f   :  { %v1048_v18 = vsel %vm133_vm0, %v1025_v54, 0.0  ;;  %v1002_v54 = vunpack.c.l.bf16 %v1530_v7 }
 0x450   :  { %v1847_v41 = vpop.permute.xlu1 %874  ;;  %v1049_v42 = vadd.f32 %v1048_v18, %v1047_v31  ;;  %v1044_v32 = vadd.f32 %v1043_v45, %v1042_v15  ;;  %v1003_v18 = vunpack.c.h.bf16 %v1530_v7  ;;  %v925_v7 = vrot.slane %v1839_v33, %v1611_v61 }
 0x451   :  { %v1026_v40 = vmul.f32 %v994_v36, %v1847_v41 }
 0x452   :  { %v1050_v49 = vrot.slane %v1049_v42, 4 }
 0x453   :  { %v1056_v56 = vsel %vm133_vm0, %v1026_v40, 0.0 }
 0x454   :  { %v1854_v44 = vpop.permute.xlu1 %877  ;;  %v1051_v23 = vadd.f32 %v1050_v49, %v1049_v42  ;;  %v1005_v42 = vunpack.c.h.bf16 %v1546_v9  ;;  %v1045_v49 = vrot.slane %v1044_v32, 1 }
 0x455   :  { %v1027_v47 = vmul.f32 %v995_v4, %v1854_v44  ;;  %v948_v4 = vrot.slane %v1865_v22, %v1614_v62  ;;  %v934_v20 = vrot.slane %v1854_v44, %v1611_v61 }
 0x456   :  { %v1052_v37 = vrot.slane %v1051_v23, 2 }
 0x457   :  { %v1057_v0 = vsel %vm133_vm0, %v1027_v47, 0.0 }
 0x458   :  { %v1058_v10 = vadd.f32 %v1057_v0, %v1056_v56  ;;  %v1860_v60 = vpop.permute.xlu1 %880  ;;  %v1053_v12 = vadd.f32 %v1052_v37, %v1051_v23  ;;  %v917_v0 = vsel %vm460_vm1, %v916_v34, %v912_v5 }
 0x459   :  { %v1028_v57 = vmul.f32 %v996_v6, %v1860_v60  ;;  %v921_v6 = vrot.slane %v1833_v30, %v1614_v62  ;;  %v939_v44 = vrot.slane %v1860_v60, %v1614_v62 }
 0x45a   :  { %v1059_v55 = vrot.slane %v1058_v10, 4  ;;  %v1054_v2 = vrot.slane %v1053_v12, 1 }
 0x45b   :  { %v1065_v8 = vsel %vm133_vm0, %v1028_v57, 0.0  ;;  %v926_v30 = vsel %vm460_vm1, %v925_v7, %v921_v6 }
 0x45c   :  { %v1060_v51 = vadd.f32 %v1059_v55, %v1058_v10  ;;  %v1867_v50 = vpop.permute.xlu1 %883  ;;  %v1055_v16 = vadd.f32 %v1054_v2, %v1053_v12 }
 0x45d   :  { %v1029_v52 = vmul.f32 %v997_v21, %v1867_v50  ;;  %v943_v33 = vrot.slane %v1867_v50, %v1611_v61 }
 0x45e   :  { %v1061_v24 = vrot.slane %v1060_v51, 2 }
 0x45f   :  { %v1066_v58 = vsel %vm133_vm0, %v1029_v52, 0.0 }
 0x460   :  { %v1067_v27 = vadd.f32 %v1066_v58, %v1065_v8  ;;  %v1874_v13 = vpop.permute.xlu1 %889  ;;  %v1062_v11 = vadd.f32 %v1061_v24, %v1060_v51  ;;  %v1046_v51 = vadd.f32 %v1045_v49, %v1044_v32 }
 0x461   :  { %v1031_v48 = vmul.f32 %v999_v19, %v1874_v13  ;;  %v930_v19 = vrot.slane %v1847_v41, %v1614_v62  ;;  %v952_v52 = vrot.slane %v1874_v13, %v1611_v61 }
 0x462   :  { %v1068_v29 = vrot.slane %v1067_v27, 4  ;;  %v1063_v40 = vrot.slane %v1062_v11, 1  ;;  %v1118_v50 = vsel %vm525_vm2, %v1055_v16, %v1046_v51 }
 0x463   :  { %v1075_v59 = vsel %vm133_vm0, %v1031_v48, 0.0  ;;  %v935_v8 = vsel %vm460_vm1, %v934_v20, %v930_v19 }
 0x464   :  { %v1069_v14 = vadd.f32 %v1068_v29, %v1067_v27  ;;  %v1076_v17 = vadd.f32 %v1075_v59, %v1074_v3  ;;  %v1880_v1 = vpop.permute.xlu1 %892  ;;  %v1064_v38 = vadd.f32 %v1063_v40, %v1062_v11  ;;  %v944_v27 = vsel %vm460_vm1, %v943_v33, %v939_v44 }
 0x465   :  { %v1032_v31 = vmul.f32 %v1000_v53, %v1880_v1  ;;  %v957_v60 = vrot.slane %v1880_v1, %v1614_v62  ;;  %v981_v59 = vsel %vm525_vm2, %v926_v30, %v917_v0  ;;  %v953_v53 = vsel %vm460_vm1, %v952_v52, %v948_v4 }
 0x466   :  { %v1070_v36 = vrot.slane %v1069_v14, 2  ;;  %v1077_v35 = vrot.slane %v1076_v17, 4  ;;  %v1119_v29 = vsel %vm527_vm3, %v1064_v38, %v1118_v50 }
 0x467   :  { %v1083_v21 = vsel %vm133_vm0, %v1032_v31, 0.0 }
 0x468   :  { %v1071_v43 = vadd.f32 %v1070_v36, %v1069_v14  ;;  %v1078_v46 = vadd.f32 %v1077_v35, %v1076_v17  ;;  %v896_v47 = vpop.permute.xlu1 %895  ;;  %v982_v17 = vsel %vm527_vm3, %v935_v8, %v981_v59 }
 0x469   :  { %v1033_v56 = vmul.f32 %v1001_v63, %v896_v47  ;;  %v961_v58 = vrot.slane %v896_v47, %v1611_v61  ;;  %v983_v63 = vsel %vm529_vm4, %v944_v27, %v982_v17 }
 0x46a   :  { %v1072_v9 = vrot.slane %v1071_v43, 1  ;;  %v1079_v10 = vrot.slane %v1078_v46, 2  ;;  %v984_v4 = vsel %vm531_vm5, %v953_v53, %v983_v63 }
 0x46b   :  { %v1084_v55 = vsel %vm133_vm0, %v1033_v56, 0.0  ;;  %v962_v28 = vsel %vm460_vm1, %v961_v58, %v957_v60 }
 0x46c   :  { %v1080_v23 = vadd.f32 %v1079_v10, %v1078_v46  ;;  %v1085_v57 = vadd.f32 %v1084_v55, %v1083_v21  ;;  %v899_v22 = vpop.permute.xlu1 %898  ;;  %v1073_v15 = vadd.f32 %v1072_v9, %v1071_v43  ;;  %v985_v40 = vsel %vm533_vm6, %v962_v28, %v984_v4 }
 0x46d   :  { %v1034_v24 = vmul.f32 %v1002_v54, %v899_v22  ;;  %v966_v11 = vrot.slane %v899_v22, %v1614_v62  ;;  %v1101_v43 = vsel %vm133_vm0, %v1036_v25, 0.0 }
 0x46e   :  { %v1081_v26 = vrot.slane %v1080_v23, 1  ;;  %v1086_v37 = vrot.slane %v1085_v57, 4  ;;  %v1120_v12 = vsel %vm529_vm4, %v1073_v15, %v1119_v29 }
 0x46f   :  { %v1092_v32 = vsel %vm133_vm0, %v1034_v24, 0.0 }
 0x470   :  { %v1082_v45 = vadd.f32 %v1081_v26, %v1080_v23  ;;  %v1087_v41 = vadd.f32 %v1086_v37, %v1085_v57  ;;  %v902_v48 = vpop.permute.xlu1 %901 }
 0x471   :  { %v970_v13 = vrot.slane %v902_v48, %v1611_v61  ;;  %v1035_v3 = vmul.f32 %v1003_v18, %v902_v48  ;;  %v975_v18 = vrot.slane %v1885_v39, %v1614_v62 }
 0x472   :  { %v1121_v14 = vsel %vm531_vm5, %v1082_v45, %v1120_v12  ;;  %v1088_v54 = vrot.slane %v1087_v41, 2 }
 0x473   :  { %v1093_v1 = vsel %vm133_vm0, %v1035_v3, 0.0  ;;  %v971_v34 = vsel %vm460_vm1, %v970_v13, %v966_v11 }
 0x474   :  { %v1094_v36 = vadd.f32 %v1093_v1, %v1092_v32  ;;  %v908_v35 = vpop.permute.xlu1 %907  ;;  %v986_v49 = vsel %vm535_vm7, %v971_v34, %v985_v40  ;;  %v1089_v7 = vadd.f32 %v1088_v54, %v1087_v41 }
 0x475   :  { %v979_v2 = vrot.slane %v908_v35, %v1611_v61  ;;  %v1037_v31 = vmul.f32 %v1005_v42, %v908_v35 }
 0x476   :  { %v1095_v5 = vrot.slane %v1094_v36, 4 }
 0x477   :  { %v980_v46 = vsel %vm460_vm1, %v979_v2, %v975_v18  ;;  %v1102_v47 = vsel %vm133_vm0, %v1037_v31, 0.0 }
 0x478   :  { %v1096_v56 = vadd.f32 %v1095_v5, %v1094_v36  ;;  %v1103_v62 = vadd.f32 %v1102_v47, %v1101_v43  ;;  %v987_v39 = vsel %vm537_vm8, %v980_v46, %v986_v49 }
 0x479   :  { %989 = vst.msk [vmem:[#allocation9] sm:$0xff] %vm540_vm9, %v987_v39 }
 0x47a   :  { %v1097_v61 = vrot.slane %v1096_v56, 2  ;;  %v1104_v42 = vrot.slane %v1103_v62, 4 }
 0x47b   :  { %1397 = shalt.err (!%p1394_p0)
}
 0x47c   :  { %s1398_s9 = scalar_lea.hbm %s1978_s5, 128 }
 0x47d   :  { %p1399_p1 = scmp.ne.s32.totalorder %s1978_s5, %s1398_s9  ;;  %p1402_p2 = scmp.lt.u32.totalorder %s1398_s9, %s1978_s5 }
 0x47f   :  { %p1404_p3 = pnand %p1402_p2, %p1399_p1 }
 0x481   :  { %1407 = shalt.err (!%p1404_p3)
}
 0x482   :  { %1146 = dma.vmem_to_hbm [thread:$0]  %s1144_s30, 128, %s1978_s5, [#allocation10]   ;;  %v1090_v25 = vrot.slane %v1089_v7, 1  ;;  %v1098_v0 = vadd.f32 %v1097_v61, %v1096_v56  ;;  %v1105_v6 = vadd.f32 %v1104_v42, %v1103_v62 }
 0x483   :  { %s1446_s15 = smov [#allocation8]  }
 0x484   :  { %v1099_v9 = vrot.slane %v1098_v0, 1  ;;  %v1106_v10 = vrot.slane %v1105_v6, 2  ;;  %v1091_v16 = vadd.f32 %v1090_v25, %v1089_v7  ;;  %s1133_s16 = sshll.u32 %s1446_s15, 4  ;;  %s1134_s16 = int_to_ptr.vmem [resolvable:$true] %s1133_s16 }
 0x485   :  { %s1408_s5 = scalar_lea.vmem %s1134_s16, 128  ;;  %p1413_p5 = scmp.lt.s32.totalorder %s1134_s16, %s1134_s16 }
 0x486   :  { %v1107_v20 = vadd.f32 %v1106_v10, %v1105_v6  ;;  %v1100_v21 = vadd.f32 %v1099_v9, %v1098_v0  ;;  %v1122_v33 = vsel %vm533_vm6, %v1091_v16, %v1121_v14  ;;  %p1409_p4 = scmp.ne.s32.totalorder %s1134_s16, %s1408_s5  ;;  %p1414_p6 = scmp.lt.s32.totalorder %s1408_s5, %s1408_s5 }
 0x488   :  { %v1108_v55 = vrot.slane %v1107_v20, 1  ;;  %v1123_v23 = vsel %vm535_vm7, %v1100_v21, %v1122_v33  ;;  %p1415_p7 = por %p1414_p6, %p1413_p5 }
 0x48a   :  { %v1109_v38 = vadd.f32 %v1108_v55, %v1107_v20  ;;  %p1416_p8 = pnand %p1415_p7, %p1409_p4 }
 0x48c   :  { %v1124_v57 = vsel %vm537_vm8, %v1109_v38, %v1123_v23 }
 0x48d   :  { %1126 = vst.msk [vmem:[#allocation8] sm:$0xff] %vm133_vm0, %v1124_v57 }
 0x48e   :  { %1419 = shalt.err (!%p1416_p8)
}
 0x48f   :  { %s1420_s19 = scalar_lea.hbm %s1977_s4, 128 }
 0x490   :  { %p1421_p9 = scmp.ne.s32.totalorder %s1977_s4, %s1420_s19  ;;  %p1424_p10 = scmp.lt.u32.totalorder %s1420_s19, %s1977_s4 }
 0x492   :  { %p1426_p11 = pnand %p1424_p10, %p1421_p9 }
 0x494   :  { %1429 = shalt.err (!%p1426_p11)
}
 0x495   :  { %1136 = dma.vmem_to_hbm [thread:$0]  %s1134_s16, 128, %s1977_s4, [#allocation4]  }
 0x496   :  { %1434 = dma.done.wait [#allocation4], 128  }
 0x497   :  { %1435 = vsyncadd [#allocation4], 4294967168 }
 0x498   :  { %1436 = dma.done.wait [#allocation10], 128  }
 0x499   :  { %1437 = vsyncadd [#allocation10], 4294967168 }
 0x49a   :  { %1153 = vsyncpa [#allocation3], 1 }
 0x49b   :  { %1154 = vsyncpa [#allocation6], 1 }
 0x49c   :  { %1155 = vsyncpa [#allocation4], 1 }
 0x49d   :  { %1156 = vsyncpa [#allocation10], 1 }

</bundles_post_ra>
